<compile_context>
chip_gen: v5e
topology: v5e:2x2
jax: 0.10.0
libtpu: 0.0.40
codegen_flags: <defaults>
</compile_context>

<pallas_src>
import functools

import jax
import jax.numpy as jnp
from jax.experimental import pallas as pl
from jax.experimental.pallas import tpu as pltpu


# ------------------------------ Pallas kernel -------------------------------

def _aff_kernel(x1_ref, x2_ref, x4_ref, w1a_ref, w1b_ref, w1c_ref, b1_ref,
                w2_ref, b2_ref, o_ref, ypad_ref, im2col_ref, *, H, W):
    """Fused AFF forward for one batch element.

    x*_ref:     (1, C*, H*W)   inputs; channels on sublanes, pixels on lanes
    w1*_ref:    (Co, C*)       1x1-conv weight column blocks (concat folded in)
    b1_ref:     (Co, 1)
    w2_ref:     (Co, 9*Co)     3x3-conv weight, tap-major / channel-minor on K
    b2_ref:     (Co, 1)
    o_ref:      (1, Co, H*W)
    ypad_ref:   (Co, H*W + 2*(W+1)) f32 scratch (zero-padded activation)
    im2col_ref: (9*Co, H*W)         f32 scratch (im2col of the activation)
    """
    HW = H * W
    PAD = W + 1
    Co = o_ref.shape[1]
    bf16 = jnp.bfloat16
    f32 = jnp.float32

    # ---- 1x1 conv over the (virtual) concat: bf16 MXU inputs, f32 accumulate.
    acc = jnp.dot(w1a_ref[...].astype(bf16), x1_ref[0].astype(bf16),
                  preferred_element_type=f32)
    acc = acc + jnp.dot(w1b_ref[...].astype(bf16), x2_ref[0].astype(bf16),
                        preferred_element_type=f32)
    acc = acc + jnp.dot(w1c_ref[...].astype(bf16), x4_ref[0].astype(bf16),
                        preferred_element_type=f32)
    y = jnp.maximum(acc + b1_ref[...], 0.0)               # (Co, HW) f32, ReLU

    # ---- zero-padded copy: row shifts (dy) become static lane slices.
    ypad_ref[...] = jnp.zeros(ypad_ref.shape, ypad_ref.dtype)
    ypad_ref[:, pl.ds(PAD, HW)] = y

    # Column-shift (dx) masks: kill cross-row leakage of the flattened layout.
    w_idx = jax.lax.broadcasted_iota(jnp.int32, (Co, HW), 1) % W
    not_left_edge = w_idx >= 1            # valid when reading column w-1
    not_right_edge = w_idx <= W - 2       # valid when reading column w+1

    # ---- build im2col (9*Co, HW): one fat-K matmul instead of 9 thin ones.
    for ky in range(3):
        for kx in range(3):
            t = ky * 3 + kx
            off = PAD + (ky - 1) * W + (kx - 1)            # static lane offset
            tap = ypad_ref[:, pl.ds(off, HW)]
            if kx == 0:
                tap = jnp.where(not_left_edge, tap, 0.0)
            elif kx == 2:
                tap = jnp.where(not_right_edge, tap, 0.0)
            im2col_ref[pl.ds(t * Co, Co), :] = tap

    # ---- 3x3 conv as (Co, 9*Co) @ (9*Co, HW) + bias (no ReLU).
    out = jnp.dot(w2_ref[...].astype(bf16), im2col_ref[...].astype(bf16),
                  preferred_element_type=f32)
    o_ref[0] = out + b2_ref[...]


# ------------------------------- JAX wrapper ---------------------------------

def aff_forward(x1, x2, x4, params):
    """AFF forward. Inputs/outputs in NCHW to match the PyTorch module."""
    B, C1, H, W = x1.shape
    C2, C4 = x2.shape[1], x4.shape[1]
    Co = params["b1"].shape[0]
    HW = H * W
    PAD = W + 1

    # Weight prep (tiny, done once in XLA): PyTorch OIHW -> kernel layouts.
    w1 = params["w1"][:, :, 0, 0]                           # (Co, C1+C2+C4)
    w1a, w1b, w1c = w1[:, :C1], w1[:, C1:C1 + C2], w1[:, C1 + C2:]
    w2 = jnp.transpose(params["w2"], (0, 2, 3, 1)).reshape(Co, 9 * Co)
    b1 = params["b1"].reshape(Co, 1)
    b2 = params["b2"].reshape(Co, 1)

    # Lane-dense activations: NCHW -> (B, C, H*W) (free reshape, no transpose).
    x1f = x1.reshape(B, C1, HW)
    x2f = x2.reshape(B, C2, HW)
    x4f = x4.reshape(B, C4, HW)

    kernel = functools.partial(_aff_kernel, H=H, W=W)
    out = pl.pallas_call(
        kernel,
        out_shape=jax.ShapeDtypeStruct((B, Co, HW), jnp.float32),
        grid=(B,),
        in_specs=[
            pl.BlockSpec((1, C1, HW), lambda n: (n, 0, 0)),
            pl.BlockSpec((1, C2, HW), lambda n: (n, 0, 0)),
            pl.BlockSpec((1, C4, HW), lambda n: (n, 0, 0)),
            pl.BlockSpec((Co, C1), lambda n: (0, 0)),
            pl.BlockSpec((Co, C2), lambda n: (0, 0)),
            pl.BlockSpec((Co, C4), lambda n: (0, 0)),
            pl.BlockSpec((Co, 1), lambda n: (0, 0)),
            pl.BlockSpec((Co, 9 * Co), lambda n: (0, 0)),
            pl.BlockSpec((Co, 1), lambda n: (0, 0)),
        ],
        out_specs=pl.BlockSpec((1, Co, HW), lambda n: (n, 0, 0)),
        scratch_shapes=[
            pltpu.VMEM((Co, HW + 2 * PAD), jnp.float32),    # padded activation
            pltpu.VMEM((9 * Co, HW), jnp.float32),          # im2col buffer
        ],
        compiler_params=pltpu.CompilerParams(
            dimension_semantics=("parallel",)),
    )(x1f, x2f, x4f, w1a, w1b, w1c, b1, w2, b2)
    return out.reshape(B, Co, H, W)


# ------------------------------- parameters ----------------------------------

def init_aff_params(key, in_channels, out_channel):
    cin = sum(in_channels)
    k1, k2, k3, k4 = jax.random.split(key, 4)
    return {
        # PyTorch Conv2d layouts: OIHW weights, (O,) biases.
        "w1": 0.1 * jax.random.normal(k1, (out_channel, cin, 1, 1), jnp.float32),
        "b1": 0.1 * jax.random.normal(k2, (out_channel,), jnp.float32),
        "w2": 0.1 * jax.random.normal(k3, (out_channel, out_channel, 3, 3), jnp.float32),
        "b2": 0.1 * jax.random.normal(k4, (out_channel,), jnp.float32),
    }


# --------------------------- pure-JAX reference -------------------------------

def _conv_ref(x, w, b, relu):
    # Precision-matched reference: bf16 conv inputs, f32 accumulate (same as
    # the kernel's MXU configuration).
    y = jax.lax.conv_general_dilated(
        x.astype(jnp.bfloat16), w.astype(jnp.bfloat16),
        window_strides=(1, 1), padding="SAME",
        dimension_numbers=("NCHW", "OIHW", "NCHW"),
        preferred_element_type=jnp.float32)
    y = y + b.reshape(1, -1, 1, 1)
    return jnp.maximum(y, 0.0) if relu else y


def aff_ref(x1, x2, x4, params):
    x = jnp.concatenate([x1, x2, x4], axis=1)               # torch.cat dim=1
    h = _conv_ref(x, params["w1"], params["b1"], relu=True)
    return _conv_ref(h, params["w2"], params["b2"], relu=False)


# ----------------------------------- main -------------------------------------

if __name__ == "__main__":
    key = jax.random.PRNGKey(0)
    kx1, kx2, kx4, kp = jax.random.split(key, 4)

    B, H, W = 2, 16, 16
    C1, C2, C4, Co = 8, 16, 32, 16        # three multi-scale feature inputs
    x1 = jax.random.normal(kx1, (B, C1, H, W), jnp.float32)   # NCHW
    x2 = jax.random.normal(kx2, (B, C2, H, W), jnp.float32)
    x4 = jax.random.normal(kx4, (B, C4, H, W), jnp.float32)
    params = init_aff_params(kp, (C1, C2, C4), Co)

    out = jax.block_until_ready(aff_forward(x1, x2, x4, params))
    assert out.shape == (B, Co, H, W), out.shape

    ref = jax.block_until_ready(aff_ref(x1, x2, x4, params))
    err = float(jnp.max(jnp.abs(out - ref)))
    assert err < 2e-2, err

    print("KERNEL_OK")
</pallas_src>

<mosaic_0001>
module attributes {stable_mosaic.version = 11 : i64} {
  func.func @_aff_kernel(%arg0: i32, %arg1: memref<1x8x256xf32, #tpu.memory_space<vmem>>, %arg2: memref<1x16x256xf32, #tpu.memory_space<vmem>>, %arg3: memref<1x32x256xf32, #tpu.memory_space<vmem>>, %arg4: memref<16x8xf32, #tpu.memory_space<vmem>>, %arg5: memref<16x16xf32, #tpu.memory_space<vmem>>, %arg6: memref<16x32xf32, #tpu.memory_space<vmem>>, %arg7: memref<16x1xf32, #tpu.memory_space<vmem>>, %arg8: memref<16x144xf32, #tpu.memory_space<vmem>>, %arg9: memref<16x1xf32, #tpu.memory_space<vmem>>, %arg10: memref<1x16x256xf32, #tpu.memory_space<vmem>>, %arg11: memref<16x290xf32, #tpu.memory_space<vmem>>, %arg12: memref<144x256xf32, #tpu.memory_space<vmem>>) attributes {dimension_semantics = [#tpu.dimension_semantics<parallel>], iteration_bounds = array<i64: 2>, scalar_prefetch = 0 : i64, scratch_operands = 2 : i64, tpu.core_type = #tpu.core_type<tc>, window_params = [{transform_indices = @transform_0, window_bounds = array<i64: 1, 8, 256>}, {transform_indices = @transform_1, window_bounds = array<i64: 1, 16, 256>}, {transform_indices = @transform_2, window_bounds = array<i64: 1, 32, 256>}, {pipeline_mode = #tpu.pipeline_mode<synchronous>, transform_indices = @transform_3, window_bounds = array<i64: 16, 8>}, {pipeline_mode = #tpu.pipeline_mode<synchronous>, transform_indices = @transform_4, window_bounds = array<i64: 16, 16>}, {pipeline_mode = #tpu.pipeline_mode<synchronous>, transform_indices = @transform_5, window_bounds = array<i64: 16, 32>}, {pipeline_mode = #tpu.pipeline_mode<synchronous>, transform_indices = @transform_6, window_bounds = array<i64: 16, 1>}, {pipeline_mode = #tpu.pipeline_mode<synchronous>, transform_indices = @transform_7, window_bounds = array<i64: 16, 144>}, {pipeline_mode = #tpu.pipeline_mode<synchronous>, transform_indices = @transform_8, window_bounds = array<i64: 16, 1>}, {transform_indices = @transform_9, window_bounds = array<i64: 1, 16, 256>}]} {
    %c0 = arith.constant 0 : index
    %c0_0 = arith.constant 0 : index
    %0 = vector.load %arg4[%c0, %c0_0] : memref<16x8xf32, #tpu.memory_space<vmem>>, vector<16x8xf32>
    %1 = arith.truncf %0 : vector<16x8xf32> to vector<16x8xbf16>
    %c0_1 = arith.constant 0 : index
    %c0_2 = arith.constant 0 : index
    %c0_3 = arith.constant 0 : index
    %2 = vector.load %arg1[%c0_1, %c0_2, %c0_3] : memref<1x8x256xf32, #tpu.memory_space<vmem>>, vector<1x8x256xf32>
    %3 = vector.shape_cast %2 : vector<1x8x256xf32> to vector<8x256xf32>
    %4 = arith.truncf %3 : vector<8x256xf32> to vector<8x256xbf16>
    %cst = arith.constant dense<0.000000e+00> : vector<16x256xf32>
    %5 = tpu.matmul %1, %4, %cst {dimension_numbers = #tpu.dot_dimension_numbers<[1], [0], [0], [1], [0, 0, 1, 1], [], []>} : vector<16x8xbf16>, vector<8x256xbf16>, vector<16x256xf32> -> vector<16x256xf32>
    %c0_4 = arith.constant 0 : index
    %c0_5 = arith.constant 0 : index
    %6 = vector.load %arg5[%c0_4, %c0_5] : memref<16x16xf32, #tpu.memory_space<vmem>>, vector<16x16xf32>
    %7 = arith.truncf %6 : vector<16x16xf32> to vector<16x16xbf16>
    %c0_6 = arith.constant 0 : index
    %c0_7 = arith.constant 0 : index
    %c0_8 = arith.constant 0 : index
    %8 = vector.load %arg2[%c0_6, %c0_7, %c0_8] : memref<1x16x256xf32, #tpu.memory_space<vmem>>, vector<1x16x256xf32>
    %9 = vector.shape_cast %8 : vector<1x16x256xf32> to vector<16x256xf32>
    %10 = arith.truncf %9 : vector<16x256xf32> to vector<16x256xbf16>
    %cst_9 = arith.constant dense<0.000000e+00> : vector<16x256xf32>
    %11 = tpu.matmul %7, %10, %cst_9 {dimension_numbers = #tpu.dot_dimension_numbers<[1], [0], [0], [1], [0, 0, 1, 1], [], []>} : vector<16x16xbf16>, vector<16x256xbf16>, vector<16x256xf32> -> vector<16x256xf32>
    %12 = arith.addf %5, %11 : vector<16x256xf32>
    %c0_10 = arith.constant 0 : index
    %c0_11 = arith.constant 0 : index
    %13 = vector.load %arg6[%c0_10, %c0_11] : memref<16x32xf32, #tpu.memory_space<vmem>>, vector<16x32xf32>
    %14 = arith.truncf %13 : vector<16x32xf32> to vector<16x32xbf16>
    %c0_12 = arith.constant 0 : index
    %c0_13 = arith.constant 0 : index
    %c0_14 = arith.constant 0 : index
    %15 = vector.load %arg3[%c0_12, %c0_13, %c0_14] : memref<1x32x256xf32, #tpu.memory_space<vmem>>, vector<1x32x256xf32>
    %16 = vector.shape_cast %15 : vector<1x32x256xf32> to vector<32x256xf32>
    %17 = arith.truncf %16 : vector<32x256xf32> to vector<32x256xbf16>
    %cst_15 = arith.constant dense<0.000000e+00> : vector<16x256xf32>
    %18 = tpu.matmul %14, %17, %cst_15 {dimension_numbers = #tpu.dot_dimension_numbers<[1], [0], [0], [1], [0, 0, 1, 1], [], []>} : vector<16x32xbf16>, vector<32x256xbf16>, vector<16x256xf32> -> vector<16x256xf32>
    %19 = arith.addf %12, %18 : vector<16x256xf32>
    %c0_16 = arith.constant 0 : index
    %c0_17 = arith.constant 0 : index
    %20 = vector.load %arg7[%c0_16, %c0_17] : memref<16x1xf32, #tpu.memory_space<vmem>>, vector<16x1xf32>
    %21 = vector.broadcast %20 : vector<16x1xf32> to vector<16x256xf32>
    %22 = arith.addf %19, %21 : vector<16x256xf32>
    %cst_18 = arith.constant 0.000000e+00 : f32
    %23 = vector.broadcast %cst_18 : f32 to vector<16x256xf32>
    %24 = arith.maximumf %22, %23 : vector<16x256xf32>
    %cst_19 = arith.constant 0.000000e+00 : f32
    %25 = vector.broadcast %cst_19 : f32 to vector<16x290xf32>
    %c0_20 = arith.constant 0 : index
    %c0_21 = arith.constant 0 : index
    %26 = vector.load %arg11[%c0_20, %c0_21] : memref<16x290xf32, #tpu.memory_space<vmem>>, vector<16x290xf32>
    tpu.vector_store %arg11[%c0_20, %c0_21], %25 {strides = array<i32>} : memref<16x290xf32, #tpu.memory_space<vmem>>, vector<16x290xf32>,
    %c0_22 = arith.constant 0 : index
    %c17 = arith.constant 17 : index
    %27 = vector.load %arg11[%c0_22, %c17] : memref<16x290xf32, #tpu.memory_space<vmem>>, vector<16x256xf32>
    tpu.vector_store %arg11[%c0_22, %c17], %24 {strides = array<i32>} : memref<16x290xf32, #tpu.memory_space<vmem>>, vector<16x256xf32>,
    %28 = tpu.iota {dimensions = array<i32: 1>} : vector<16x256xi32>
    %c16_i32 = arith.constant 16 : i32
    %c0_i32 = arith.constant 0 : i32
    %29 = arith.cmpi eq, %c16_i32, %c0_i32 : i32
    %c1_i32 = arith.constant 1 : i32
    %30 = arith.select %29, %c1_i32, %c16_i32 : i32
    %31 = vector.broadcast %30 : i32 to vector<16x256xi32>
    %32 = arith.remsi %28, %31 : vector<16x256xi32>
    %c0_i32_23 = arith.constant 0 : i32
    %33 = vector.broadcast %c0_i32_23 : i32 to vector<16x256xi32>
    %34 = arith.cmpi ne, %32, %33 : vector<16x256xi32>
    %c0_i32_24 = arith.constant 0 : i32
    %35 = vector.broadcast %c0_i32_24 : i32 to vector<16x256xi32>
    %36 = arith.cmpi slt, %32, %35 : vector<16x256xi32>
    %c0_i32_25 = arith.constant 0 : i32
    %37 = arith.cmpi slt, %30, %c0_i32_25 : i32
    %38 = vector.broadcast %37 : i1 to vector<16x256xi1>
    %39 = vector.broadcast %38 : vector<16x256xi1> to vector<16x256xi1>
    %40 = arith.xori %36, %39 : vector<16x256xi1>
    %41 = arith.andi %40, %34 : vector<16x256xi1>
    %42 = vector.broadcast %30 : i32 to vector<16x256xi32>
    %43 = arith.addi %32, %42 : vector<16x256xi32>
    %44 = arith.select %41, %43, %32 : vector<16x256xi1>, vector<16x256xi32>
    %c1_i32_26 = arith.constant 1 : i32
    %45 = vector.broadcast %c1_i32_26 : i32 to vector<16x256xi32>
    %46 = arith.cmpi sge, %44, %45 : vector<16x256xi32>
    %c14_i32 = arith.constant 14 : i32
    %47 = vector.broadcast %c14_i32 : i32 to vector<16x256xi32>
    %48 = arith.cmpi sle, %44, %47 : vector<16x256xi32>
    %c0_27 = arith.constant 0 : index
    %c0_28 = arith.constant 0 : index
    %49 = vector.load %arg11[%c0_27, %c0_28] : memref<16x290xf32, #tpu.memory_space<vmem>>, vector<16x256xf32>
    %cst_29 = arith.constant 0.000000e+00 : f32
    %50 = vector.broadcast %cst_29 : f32 to vector<16x256xf32>
    %51 = arith.select %46, %49, %50 : vector<16x256xi1>, vector<16x256xf32>
    %c0_30 = arith.constant 0 : index
    %c0_31 = arith.constant 0 : index
    %52 = vector.load %arg12[%c0_30, %c0_31] : memref<144x256xf32, #tpu.memory_space<vmem>>, vector<16x256xf32>
    tpu.vector_store %arg12[%c0_30, %c0_31], %51 {strides = array<i32>} : memref<144x256xf32, #tpu.memory_space<vmem>>, vector<16x256xf32>,
    %c0_32 = arith.constant 0 : index
    %c1 = arith.constant 1 : index
    %53 = vector.load %arg11[%c0_32, %c1] : memref<16x290xf32, #tpu.memory_space<vmem>>, vector<16x256xf32>
    %c16 = arith.constant 16 : index
    %c0_33 = arith.constant 0 : index
    %54 = vector.load %arg12[%c16, %c0_33] : memref<144x256xf32, #tpu.memory_space<vmem>>, vector<16x256xf32>
    tpu.vector_store %arg12[%c16, %c0_33], %53 {strides = array<i32>} : memref<144x256xf32, #tpu.memory_space<vmem>>, vector<16x256xf32>,
    %c0_34 = arith.constant 0 : index
    %c2 = arith.constant 2 : index
    %55 = vector.load %arg11[%c0_34, %c2] : memref<16x290xf32, #tpu.memory_space<vmem>>, vector<16x256xf32>
    %cst_35 = arith.constant 0.000000e+00 : f32
    %56 = vector.broadcast %cst_35 : f32 to vector<16x256xf32>
    %57 = arith.select %48, %55, %56 : vector<16x256xi1>, vector<16x256xf32>
    %c32 = arith.constant 32 : index
    %c0_36 = arith.constant 0 : index
    %58 = vector.load %arg12[%c32, %c0_36] : memref<144x256xf32, #tpu.memory_space<vmem>>, vector<16x256xf32>
    tpu.vector_store %arg12[%c32, %c0_36], %57 {strides = array<i32>} : memref<144x256xf32, #tpu.memory_space<vmem>>, vector<16x256xf32>,
    %c0_37 = arith.constant 0 : index
    %c16_38 = arith.constant 16 : index
    %59 = vector.load %arg11[%c0_37, %c16_38] : memref<16x290xf32, #tpu.memory_space<vmem>>, vector<16x256xf32>
    %cst_39 = arith.constant 0.000000e+00 : f32
    %60 = vector.broadcast %cst_39 : f32 to vector<16x256xf32>
    %61 = arith.select %46, %59, %60 : vector<16x256xi1>, vector<16x256xf32>
    %c48 = arith.constant 48 : index
    %c0_40 = arith.constant 0 : index
    %62 = vector.load %arg12[%c48, %c0_40] : memref<144x256xf32, #tpu.memory_space<vmem>>, vector<16x256xf32>
    tpu.vector_store %arg12[%c48, %c0_40], %61 {strides = array<i32>} : memref<144x256xf32, #tpu.memory_space<vmem>>, vector<16x256xf32>,
    %c0_41 = arith.constant 0 : index
    %c17_42 = arith.constant 17 : index
    %63 = vector.load %arg11[%c0_41, %c17_42] : memref<16x290xf32, #tpu.memory_space<vmem>>, vector<16x256xf32>
    %c64 = arith.constant 64 : index
    %c0_43 = arith.constant 0 : index
    %64 = vector.load %arg12[%c64, %c0_43] : memref<144x256xf32, #tpu.memory_space<vmem>>, vector<16x256xf32>
    tpu.vector_store %arg12[%c64, %c0_43], %63 {strides = array<i32>} : memref<144x256xf32, #tpu.memory_space<vmem>>, vector<16x256xf32>,
    %c0_44 = arith.constant 0 : index
    %c18 = arith.constant 18 : index
    %65 = vector.load %arg11[%c0_44, %c18] : memref<16x290xf32, #tpu.memory_space<vmem>>, vector<16x256xf32>
    %cst_45 = arith.constant 0.000000e+00 : f32
    %66 = vector.broadcast %cst_45 : f32 to vector<16x256xf32>
    %67 = arith.select %48, %65, %66 : vector<16x256xi1>, vector<16x256xf32>
    %c80 = arith.constant 80 : index
    %c0_46 = arith.constant 0 : index
    %68 = vector.load %arg12[%c80, %c0_46] : memref<144x256xf32, #tpu.memory_space<vmem>>, vector<16x256xf32>
    tpu.vector_store %arg12[%c80, %c0_46], %67 {strides = array<i32>} : memref<144x256xf32, #tpu.memory_space<vmem>>, vector<16x256xf32>,
    %c0_47 = arith.constant 0 : index
    %c32_48 = arith.constant 32 : index
    %69 = vector.load %arg11[%c0_47, %c32_48] : memref<16x290xf32, #tpu.memory_space<vmem>>, vector<16x256xf32>
    %cst_49 = arith.constant 0.000000e+00 : f32
    %70 = vector.broadcast %cst_49 : f32 to vector<16x256xf32>
    %71 = arith.select %46, %69, %70 : vector<16x256xi1>, vector<16x256xf32>
    %c96 = arith.constant 96 : index
    %c0_50 = arith.constant 0 : index
    %72 = vector.load %arg12[%c96, %c0_50] : memref<144x256xf32, #tpu.memory_space<vmem>>, vector<16x256xf32>
    tpu.vector_store %arg12[%c96, %c0_50], %71 {strides = array<i32>} : memref<144x256xf32, #tpu.memory_space<vmem>>, vector<16x256xf32>,
    %c0_51 = arith.constant 0 : index
    %c33 = arith.constant 33 : index
    %73 = vector.load %arg11[%c0_51, %c33] : memref<16x290xf32, #tpu.memory_space<vmem>>, vector<16x256xf32>
    %c112 = arith.constant 112 : index
    %c0_52 = arith.constant 0 : index
    %74 = vector.load %arg12[%c112, %c0_52] : memref<144x256xf32, #tpu.memory_space<vmem>>, vector<16x256xf32>
    tpu.vector_store %arg12[%c112, %c0_52], %73 {strides = array<i32>} : memref<144x256xf32, #tpu.memory_space<vmem>>, vector<16x256xf32>,
    %c0_53 = arith.constant 0 : index
    %c34 = arith.constant 34 : index
    %75 = vector.load %arg11[%c0_53, %c34] : memref<16x290xf32, #tpu.memory_space<vmem>>, vector<16x256xf32>
    %cst_54 = arith.constant 0.000000e+00 : f32
    %76 = vector.broadcast %cst_54 : f32 to vector<16x256xf32>
    %77 = arith.select %48, %75, %76 : vector<16x256xi1>, vector<16x256xf32>
    %c128 = arith.constant 128 : index
    %c0_55 = arith.constant 0 : index
    %78 = vector.load %arg12[%c128, %c0_55] : memref<144x256xf32, #tpu.memory_space<vmem>>, vector<16x256xf32>
    tpu.vector_store %arg12[%c128, %c0_55], %77 {strides = array<i32>} : memref<144x256xf32, #tpu.memory_space<vmem>>, vector<16x256xf32>,
    %c0_56 = arith.constant 0 : index
    %c0_57 = arith.constant 0 : index
    %79 = vector.load %arg8[%c0_56, %c0_57] : memref<16x144xf32, #tpu.memory_space<vmem>>, vector<16x144xf32>
    %80 = arith.truncf %79 : vector<16x144xf32> to vector<16x144xbf16>
    %c0_58 = arith.constant 0 : index
    %c0_59 = arith.constant 0 : index
    %81 = vector.load %arg12[%c0_58, %c0_59] : memref<144x256xf32, #tpu.memory_space<vmem>>, vector<144x256xf32>
    %82 = arith.truncf %81 : vector<144x256xf32> to vector<144x256xbf16>
    %cst_60 = arith.constant dense<0.000000e+00> : vector<16x256xf32>
    %83 = tpu.matmul %80, %82, %cst_60 {dimension_numbers = #tpu.dot_dimension_numbers<[1], [0], [0], [1], [0, 0, 1, 1], [], []>} : vector<16x144xbf16>, vector<144x256xbf16>, vector<16x256xf32> -> vector<16x256xf32>
    %c0_61 = arith.constant 0 : index
    %c0_62 = arith.constant 0 : index
    %84 = vector.load %arg9[%c0_61, %c0_62] : memref<16x1xf32, #tpu.memory_space<vmem>>, vector<16x1xf32>
    %85 = vector.broadcast %84 : vector<16x1xf32> to vector<16x256xf32>
    %86 = arith.addf %83, %85 : vector<16x256xf32>
    %c0_63 = arith.constant 0 : index
    %c0_64 = arith.constant 0 : index
    %c0_65 = arith.constant 0 : index
    %87 = vector.load %arg10[%c0_63, %c0_64, %c0_65] : memref<1x16x256xf32, #tpu.memory_space<vmem>>, vector<1x16x256xf32>
    %88 = vector.shape_cast %87 : vector<1x16x256xf32> to vector<16x256xf32>
    %89 = vector.shape_cast %86 : vector<16x256xf32> to vector<1x16x256xf32>
    tpu.vector_store %arg10[%c0_63, %c0_64, %c0_65], %89 {strides = array<i32>} : memref<1x16x256xf32, #tpu.memory_space<vmem>>, vector<1x16x256xf32>,
    return
  }
  func.func @transform_0(%arg0: i32) -> (i32, i32, i32) {
    %c0_i32 = arith.constant 0 : i32
    %c0_i32_0 = arith.constant 0 : i32
    %c0_i32_1 = arith.constant 0 : i32
    return %arg0, %c0_i32, %c0_i32_0 : i32, i32, i32
  }
  func.func @transform_1(%arg0: i32) -> (i32, i32, i32) {
    %c0_i32 = arith.constant 0 : i32
    %c0_i32_0 = arith.constant 0 : i32
    %c0_i32_1 = arith.constant 0 : i32
    return %arg0, %c0_i32, %c0_i32_0 : i32, i32, i32
  }
  func.func @transform_2(%arg0: i32) -> (i32, i32, i32) {
    %c0_i32 = arith.constant 0 : i32
    %c0_i32_0 = arith.constant 0 : i32
    %c0_i32_1 = arith.constant 0 : i32
    return %arg0, %c0_i32, %c0_i32_0 : i32, i32, i32
  }
  func.func @transform_3(%arg0: i32) -> (i32, i32) {
    %c0_i32 = arith.constant 0 : i32
    %c0_i32_0 = arith.constant 0 : i32
    %c0_i32_1 = arith.constant 0 : i32
    return %c0_i32, %c0_i32_0 : i32, i32
  }
  func.func @transform_4(%arg0: i32) -> (i32, i32) {
    %c0_i32 = arith.constant 0 : i32
    %c0_i32_0 = arith.constant 0 : i32
    %c0_i32_1 = arith.constant 0 : i32
    return %c0_i32, %c0_i32_0 : i32, i32
  }
  func.func @transform_5(%arg0: i32) -> (i32, i32) {
    %c0_i32 = arith.constant 0 : i32
    %c0_i32_0 = arith.constant 0 : i32
    %c0_i32_1 = arith.constant 0 : i32
    return %c0_i32, %c0_i32_0 : i32, i32
  }
  func.func @transform_6(%arg0: i32) -> (i32, i32) {
    %c0_i32 = arith.constant 0 : i32
    %c0_i32_0 = arith.constant 0 : i32
    %c0_i32_1 = arith.constant 0 : i32
    return %c0_i32, %c0_i32_0 : i32, i32
  }
  func.func @transform_7(%arg0: i32) -> (i32, i32) {
    %c0_i32 = arith.constant 0 : i32
    %c0_i32_0 = arith.constant 0 : i32
    %c0_i32_1 = arith.constant 0 : i32
    return %c0_i32, %c0_i32_0 : i32, i32
  }
  func.func @transform_8(%arg0: i32) -> (i32, i32) {
    %c0_i32 = arith.constant 0 : i32
    %c0_i32_0 = arith.constant 0 : i32
    %c0_i32_1 = arith.constant 0 : i32
    return %c0_i32, %c0_i32_0 : i32, i32
  }
  func.func @transform_9(%arg0: i32) -> (i32, i32, i32) {
    %c0_i32 = arith.constant 0 : i32
    %c0_i32_0 = arith.constant 0 : i32
    %c0_i32_1 = arith.constant 0 : i32
    return %arg0, %c0_i32, %c0_i32_0 : i32, i32, i32
  }
}

</mosaic_0001>

<bundles_post_ra>
// kernel: tpu_custom_call.1
= control target key start
LH: loop header
LB: loop body
LE: loop exit
PB: predicated region body
PF: predicated region fallthrough
CT: control target
= control target key end

     0   :  { %s2215_s0 = inlined_call_operand.vmem [shape: f32[2,8,256], index: 0, kind: input, shape index: {}]   ;;  %s2216_s1 = inlined_call_operand.hbm [shape: f32[2,16,256], index: 1, kind: input, shape index: {}]   ;;  %s2217_s2 = inlined_call_operand.hbm [shape: f32[2,32,256], index: 2, kind: input, shape index: {}]   ;;  %s2218_s3 = inlined_call_operand.vmem [shape: f32[16,8], index: 3, kind: input, shape index: {}]   ;;  %s2219_s4 = inlined_call_operand.vmem [shape: f32[16,16], index: 4, kind: input, shape index: {}]   ;;  %s2220_s5 = inlined_call_operand.hbm [shape: f32[16,32], index: 5, kind: input, shape index: {}]   ;;  %s2221_s6 = inlined_call_operand.vmem [shape: f32[16,1], index: 6, kind: input, shape index: {}]   ;;  %s2222_s7 = inlined_call_operand.hbm [shape: f32[16,144], index: 7, kind: input, shape index: {}]   ;;  %s2223_s8 = inlined_call_operand.vmem [shape: f32[16,1], index: 8, kind: input, shape index: {}]   ;;  %s2224_s9 = inlined_call_operand.hbm [shape: f32[2,16,256], index: 9, kind: output, shape index: {}]  }
   0x1   :  { %2236 = sst [smem:[#allocation24_spill]] %s2220_s5 }
   0x2   :  { %2237 = sst [smem:[#allocation25_spill]] %s2222_s7 }
   0x3   :  { %14 = vsyncpa [#allocation5], 0 }
   0x4   :  { %16 = vsyncpa [#allocation5 + $0x1], 0 }
   0x5   :  { %17 = vsyncpa [#allocation8], 0 }
   0x6   :  { %19 = vsyncpa [#allocation8 + $0x1], 0 }
   0x7   :  { %20 = vsyncpa [#allocation11], 0 }
   0x8   :  { %21 = vsyncpa [#allocation6], 0 }
   0x9   :  { %23 = vsyncpa [#allocation6 + $0x1], 0  ;;  %s1831_s30 = smov 0   ;;  %s1833_s10 = smov 0  }
   0xa   :  { %s1835_s11 = smov 0   ;;  %s1837_s12 = smov 0  }
   0xb LB: > { %2238 = sst [smem:[#allocation18_spill]] %s1748_s30  ;;  %s1852_s13 = sadd.s32 4294967295, %s1760_s12   ;;  %s1760_s12 = sphi %s1837_s12, %s2271_s12   ;;  %s1756_s11 = sphi %s1835_s11, %s2273_s11   ;;  %s1752_s10 = sphi %s1833_s10, %s2275_s10   ;;  %s1748_s30 = sphi %s1831_s30, %s2274_s30  }
   0xc   : > { %2239 = sst [smem:[#allocation19_spill]] %s1756_s11  ;;  %s1279_s14 = sadd.s32 4294967294, %s1760_s12  }
   0xd   : > { %p75_p0 = scmp.ne.s32.totalorder %s1752_s10, %s1748_s30  ;;  %p76_p1 = scmp.eq.s32.totalorder %s1852_s13, 0 }
   0xe   : > { %p251_p2 = scmp.eq.s32.totalorder %s1852_s13, 1  ;;  %p257_p3 = scmp.eq.s32.totalorder %s1279_s14, 1 }
   0xf   : > { %p1861_p4 = por %p76_p1, %p75_p0  ;;  %p1280_p5 = scmp.ge.s32.totalorder %s1760_s12, 1 }
  0x10   : > { %p1866_p6 = por %p257_p3, %p75_p0  ;;  %p264_p7 = scmp.lt.s32.totalorder %s1760_s12, 3 }
  0x11   : > { %s2243_s5 = sld [smem:[#allocation24_spill]]  ;;  %s1762_s21 = smov [#allocation9]  }
  0x12   : > { %s2241_s16 = scalar_select %p1866_p6, 1, 0 }
  0x13   : > { %p1874_p8 = pnand %p1280_p5, %p264_p7  ;;  %s283_s22 = sshll.u32 %s1762_s21, 4  ;;  %s284_s22 = int_to_ptr.vmem [resolvable:$true] %s283_s22 }
  0x14   : > { %2242 = sst [smem:[#allocation20_spill]] %s2241_s16  ;;  %s1763_s26 = smov 128  }
  0x15   : > { %p1365_p9 = pneg %p1874_p8  ;;  %s2245_s7 = sld [smem:[#allocation25_spill]] }
  0x16   : > { %s1764_s27 = smov 8   ;;  %s1765_s28 = smov [#allocation10]  }
  0x17   : > { %s281_s19 = sshll.u32 %s2243_s5, 4  ;;  %p1366_p10 = pnand %p1365_p9, %p76_p1  ;;  %s282_s19 = int_to_ptr.hbm [resolvable:$true] %s281_s19 }
  0x18   : > { %s300_s29 = sshll.u32 %s1765_s28, 4  ;;  %s2225_s14 = smov 256   ;;  %s301_s29 = int_to_ptr.vmem [resolvable:$true] %s300_s29 }
  0x19   : > { %1368 = dma.hbm_to_vmem [thread:$0]  (!%p1366_p10), %s282_s19, 256, %s284_s22, [#allocation8], %s1763_s26, %s1763_s26, %s1764_s27  }
  0x1a   : > { %s2227_s17 = smov 16   ;;  %s1890_s18 = sadd.s32 1, %s1760_s12  }
  0x1b   : > { %s298_s25 = sshll.u32 %s2245_s7, 4  ;;  %2246 = sst [smem:[#allocation21_spill]] %s1890_s18  ;;  %s299_s25 = int_to_ptr.hbm [resolvable:$true] %s298_s25 }
  0x1c   : > { %1371 = dma.hbm_to_vmem [thread:$0]  (!%p1366_p10), %s299_s25, 512, %s301_s29, [#allocation11], %s2225_s14, %s2225_s14, %s2227_s17  }
  0x1d   : > { %s59_s21 = ssub.s32 %s1760_s12, %s1890_s18  ;;  %s62_s23 = sadd.s32 1, %s1756_s11 }
  0x1e   : > { %p60_p12 = scmp.eq.s32.totalorder %s59_s21, 0  ;;  %p69_p13 = scmp.ne.s32.totalorder %s1756_s11, %s1752_s10 }
  0x1f   : > { %p70_p0 = scmp.eq.s32.totalorder %s1760_s12, 0  ;;  %p1385_p7 = scmp.lt.s32.totalorder %s1760_s12, 2 }
  0x20   : > { %s1899_s19 = scalar_select %p60_p12, %s1756_s11, %s62_s23  }
  0x21   : > { %p71_p3 = por %p70_p0, %p69_p13  ;;  %p1903_p5 = por %p251_p2, %p69_p13 }
  0x22   : > { %2247 = sst [smem:[#allocation22_spill]] %s1899_s19  ;;  %s1909_s24 = sand.u32 1, %s1756_s11  }
  0x23   : > { %s2248_s22 = scalar_select %p1903_p5, 1, 0 }
  0x24   : > { %s1284_s25 = sshll.u32 %s1909_s24, 5  ;;  %s1311_s26 = sshll.u32 %s1760_s12, 5 }
  0x25   : > { %2249 = sst [smem:[#allocation23_spill]] %s2248_s22  ;;  %s334_s29 = scalar_lea.hbm %s2216_s1, %s1311_s26 }
  0x26   : > { %s329_s21 = scalar_lea.vmem [#allocation4], %s1284_s25  ;;  %s335_s14 = sshll.u32 %s334_s29, 4  ;;  %s336_s14 = int_to_ptr.hbm [resolvable:$true] %s335_s14 }
  0x27   : > { %s337_s23 = sshll.u32 %s329_s21, 4  ;;  %p1916_p2 = pnand %p1385_p7, %p71_p3  ;;  %s338_s23 = int_to_ptr.vmem [resolvable:$true] %s337_s23 }
  0x28   : > { %s347_s5 = sand.u32 1, %s1760_s12   ;;  %s1287_s7 = sshll.u32 %s1909_s24, 6 }
  0x29   : > { %s326_s19 = scalar_lea.sflag [#allocation5], %s1909_s24  ;;  %s1622_s11 = sshra.s32 %s336_s14, 4  ;;  %s1623_s11 = int_to_ptr.hbm [resolvable:$true] %s1622_s11 }
  0x2a   : > { %s1624_s18 = scalar_lea.hbm %s1623_s11, 32  ;;  %p1626_p10 = pneg %p1916_p2 }
  0x2b   : > { %p1625_p9 = scmp.ne.s32.totalorder %s1623_s11, %s1624_s18  ;;  %s1629_s27 = scalar_lea.hbm %s2216_s1, 64 }
  0x2c   : > { %p1630_p0 = scmp.lt.s32.totalorder %s1623_s11, %s2216_s1  ;;  %p1631_p3 = scmp.lt.s32.totalorder %s1629_s27, %s1624_s18 }
  0x2d   : > { %p1627_p12 = pnand %p1626_p10, %p1625_p9 }
  0x2e   : > { %p1632_p7 = por %p1631_p3, %p1630_p0 }
  0x2f   : > { %p1628_p13 = pneg %p1627_p12 }
  0x31   : > { %p1633_p11 = pnand %p1632_p7, %p1628_p13 }
  0x33   : > { %1636 = shalt.err (!%p1633_p11)
}
  0x34   : > { %s2251_s24 = smov 16   ;;  %s2252_s21 = smov 256  }
  0x35   : > { %1375 = dma.hbm_to_vmem [thread:$0]  (!%p1916_p2), %s336_s14, 512, %s338_s23, %s326_s19, %s2252_s21, %s2252_s21, %s2251_s24  }
  0x36   : > { %s1312_s16 = sshll.u32 %s1760_s12, 6  ;;  %s351_s22 = scalar_lea.vmem [#allocation7], %s1287_s7 }
  0x37   : > { %s356_s26 = scalar_lea.hbm %s2217_s2, %s1312_s16  ;;  %s359_s28 = sshll.u32 %s351_s22, 4  ;;  %s360_s28 = int_to_ptr.vmem [resolvable:$true] %s359_s28 }
  0x38   : > { %s357_s11 = sshll.u32 %s356_s26, 4  ;;  %s348_s18 = scalar_lea.sflag [#allocation8], %s347_s5  ;;  %s358_s11 = int_to_ptr.hbm [resolvable:$true] %s357_s11 }
  0x39   : > { %s1652_s27 = sshra.s32 %s358_s11, 4  ;;  %s1659_s23 = scalar_lea.hbm %s2217_s2, 128  ;;  %s1653_s27 = int_to_ptr.hbm [resolvable:$true] %s1652_s27 }
  0x3a   : > { %s1654_s29 = scalar_lea.hbm %s1653_s27, 64  ;;  %p1660_p13 = scmp.lt.s32.totalorder %s1653_s27, %s2217_s2 }
  0x3b   : > { %p1655_p11 = scmp.ne.s32.totalorder %s1653_s27, %s1654_s29  ;;  %p1661_p0 = scmp.lt.s32.totalorder %s1659_s23, %s1654_s29 }
  0x3d   : > { %p1657_p9 = pnand %p1655_p11, %p1626_p10  ;;  %p1662_p3 = por %p1661_p0, %p1660_p13 }
  0x3f   : > { %p1658_p12 = pneg %p1657_p9 }
  0x41   : > { %p1663_p7 = pnand %p1662_p3, %p1658_p12 }
  0x43   : > { %1666 = shalt.err (!%p1663_p7)
}
  0x44   : > { %1378 = dma.hbm_to_vmem [thread:$0]  (!%p1916_p2), %s358_s11, 1024, %s360_s28, %s348_s18, %s2252_s21, %s2252_s21, %s2251_s24  }
  0x45   : > { %371 = sbr.rel (%p1874_p8) target bundleno = 707 (0x2c3), region = 56  ;;  %s1960_s5 = sand.u32 (!%p1874_p8), 1, %s1752_s10  }
  0x46   : > { %s1291_s7 = sshll.u32 (!%p1874_p8), %s1960_s5, 5  ;;  %s374_s22 = scalar_lea.sflag (!%p1874_p8), [#allocation5], %s1960_s5 }
  0x47   : > { %s1966_s25 = scalar_lea.vmem (!%p1874_p8), [#allocation4], %s1291_s7 }
  0x4a   : > { %1727 = dma.done.wait (%p1861_p4), %s374_s22, 512  }
  0x4b   : > { %1729 = vsyncadd (%p1861_p4), %s374_s22, 4294966784  ;;  %s383_s20 = sand.u32 1, %s1852_s13   ;;  %s1292_s17 = sshll.u32 %s1960_s5, 6 }
  0x4c   : > { %s384_s24 = scalar_lea.sflag [#allocation8], %s383_s20  ;;  %s1974_s21 = scalar_lea.vmem [#allocation7], %s1292_s17 }
  0x4d   : > { %1731 = dma.done.wait (%p1861_p4), %s384_s24, 1024  }
  0x4e   : > { %1733 = vsyncadd (%p1861_p4), %s384_s24, 4294966272 }
  0x4f   : > { %1735 = dma.done.wait (%p76_p1), [#allocation8], 256  }
  0x50   : > { %1737 = vsyncadd (%p76_p1), [#allocation8], 4294967040 }
  0x51   : > { %1739 = dma.done.wait (%p76_p1), [#allocation11], 512  }
  0x52   : > { %1741 = vsyncadd (%p76_p1), [#allocation11], 4294966784  ;;  %p443_p8 = scmp.lt.s32.totalorder %s1852_s13, 1  ;;  %v1768_v0 = vmov 0   ;;  %v460_v1 = vld [vmem:[%s1966_s25 + $0x8] sm:$0xff]  ;;  %v462_v2 = vld [vmem:[%s1966_s25 + $0x18] sm:$0xff] }
  0x53   : > { %1440 = vset.pattern.permute.xlu0 %v1768_v0  ;;  %1561 = vset.pattern.permute.xlu1 %v1768_v0  ;;  %vm501_vm0 = vcmask 1043456   ;;  %v464_v4 = vpack.c.bf16 %v462_v2, %v460_v1  ;;  %v456_v6 = vld [vmem:[%s2219_s4] sm:$0xff]  ;;  %v457_v7 = vld [vmem:[%s2219_s4 + $0x8] sm:$0xff]  ;;  %v544_v12 = vld [vmem:[%s1974_s21 + $0x28] sm:$0xff]  ;;  %vm465_vm1 = vcmask 130048   ;;  %vm497_vm2 = vcmask 64512  }
  0x54   : > { %s444_s26 = scalar_select %p443_p8, %s1852_s13, 1  ;;  %v449_v8 = vld [vmem:[%s2218_s3] sm:$0xff]  ;;  %v458_v9 = vpack.c.bf16 %v457_v7, %v456_v6  ;;  %v450_v10 = vld [vmem:[%s2218_s3 + $0x8] sm:$0xff]  ;;  %v459_v17 = vld [vmem:[%s1966_s25] sm:$0xff]  ;;  %vm551_vm3 = vcmask 261120   ;;  %v1769_v40 = vmov 0.0  }
  0x55   : > { %490 = vmatpush.bf16.msra.mxu1 %v464_v4  ;;  %v451_v14 = vpack.c.bf16 %v450_v10, %v449_v8  ;;  %v546_v16 = vld [vmem:[%s1974_s21 + $0x38] sm:$0xff]  ;;  %v461_v18 = vld [vmem:[%s1966_s25 + $0x10] sm:$0xff]  ;;  %v543_v21 = vld [vmem:[%s1974_s21 + $0x20] sm:$0xff]  ;;  %611 = vst [vmem:[#allocation2 + $0x18] sm:$0xff] %v1769_v40  ;;  %vm609_vm4 = vcmask 277504   ;;  %vm635_vm5 = vcmask 1047688  }
  0x56   : > { %s1313_s15 = sshll.u32 %s444_s26, 4  ;;  %v550_v19 = vpack.c.bf16 %v546_v16, %v544_v12  ;;  %v463_v20 = vpack.c.bf16 %v461_v18, %v459_v17  ;;  %v545_v22 = vld [vmem:[%s1974_s21 + $0x30] sm:$0xff]  ;;  %v540_v23 = vld [vmem:[%s1974_s21 + $0x8] sm:$0xff]  ;;  %v542_v26 = vld [vmem:[%s1974_s21 + $0x18] sm:$0xff]  ;;  %607 = vst [vmem:[#allocation2] sm:$0xff] %v1769_v40  ;;  %vm626_vm6 = vcmask 138240  }
  0x57   : > { %s447_s18 = scalar_lea.vmem %s2215_s0, %s1313_s15  ;;  %v549_v25 = vpack.c.bf16 %v545_v22, %v543_v21  ;;  %v539_v27 = vld [vmem:[%s1974_s21] sm:$0xff]  ;;  %v541_v28 = vld [vmem:[%s1974_s21 + $0x10] sm:$0xff]  ;;  %v548_v30 = vpack.c.bf16 %v542_v26, %v540_v23  ;;  %v588_v32 = vld [vmem:[%s2221_s6 + $0x8] sm:$0xff]  ;;  %s1770_s21 = smov 17   ;;  %613 = vst.msk [vmem:[#allocation2 + $0x28] sm:$0xff] %vm609_vm4, %v1769_v40  ;;  %vm947_vm7 = vcmask 777216  }
  0x58   : > { %v453_v3 = vld [vmem:[%s447_s18 + $0x8] sm:$0xff]  ;;  %v452_v11 = vld [vmem:[%s447_s18] sm:$0xff]  ;;  %1299 = vmatmul.msk.bf16.vlgmr.msra.gmra.mxu1 %vm465_vm1, %v458_v9  ;;  %476 = vmatpush.bf16.msra.mxu0 %v463_v20  ;;  %v547_v31 = vpack.c.bf16 %v541_v28, %v539_v27  ;;  %v536_v33 = vld [vmem:[#allocation9] sm:$0xff]  ;;  %610 = vst.msk [vmem:[#allocation2 + $0x10] sm:$0xff] %vm609_vm4, %v1769_v40  ;;  %s1771_s26 = smov 95   ;;  %s1772_s15 = smov 96   ;;  %v642_v27 = vlaneseq }
  0x59   : > { %v455_v5 = vpack.c.bf16 %v453_v3, %v453_v3  ;;  %v454_v15 = vpack.c.bf16 %v452_v11, %v452_v11  ;;  %v587_v29 = vld [vmem:[%s2221_s6] sm:$0xff]  ;;  %575 = vmatpush.bf16.msrb.mxu1 %v550_v19  ;;  %v537_v34 = vld [vmem:[#allocation9 + $0x8] sm:$0xff]  ;;  %s1773_s28 = smov 110   ;;  %s1774_s11 = smov 111   ;;  %vm906_vm8 = vcmask 785408   ;;  %vm865_vm12 = vcmask 900096  }
  0x5a   : > { %591 = vperm.xlu0 %1440, %v587_v29   ;;  %v538_v35 = vpack.c.bf16 %v537_v34, %v536_v33  ;;  %s1775_s18 = smov 112   ;;  %s1776_s27 = smov 126   ;;  %v1061_v18 = vld [vmem:[%s2223_s8] sm:$0xff]  ;;  %v643_v29 = vand.u32 127, %v642_v27  ;;  %v1062_v27 = vld [vmem:[%s2223_s8 + $0x8] sm:$0xff]  ;;  %vm787_vm4 = vcmask 916480  }
  0x5b   : > { %v506_v13 = vsel %vm501_vm0, %v455_v5, 0  ;;  %v503_v24 = vsel %vm501_vm0, %v454_v15, 0  ;;  %1298 = vmatmul.msk.bf16.vlgmr.msra.gmra.mxu0 %vm465_vm1, %v458_v9  ;;  %s1777_s29 = smov 127   ;;  %s1778_s14 = smov 94  }
  0x5c   : > { %529 = vmatpush.bf16.msra.mxu3 %v506_v13  ;;  %515 = vmatpush.bf16.msra.mxu2 %v503_v24  ;;  %s442_s22 = scalar_lea.vmem [#allocation12], %s1291_s7  ;;  %s1314_s20 = sshll.u32 %s1852_s13, 5 }
  0x5d   : > { %576 = vmatpush.bf16.msrb.mxu1 %v548_v30  ;;  %s1148_s24 = scalar_lea.hbm %s2224_s9, %s1314_s20  ;;  %s1137_s13 = scalar_lea.sflag [#allocation6], %s1960_s5 }
  0x5e   : > { %s1151_s7 = sshll.u32 %s1148_s24, 4  ;;  %s1152_s7 = int_to_ptr.hbm [resolvable:$true] %s1151_s7 }
  0x5f   : > { %1301 = vmatmul.msk.bf16.vlgmr.msra.gmra.mxu3 %vm497_vm2, %v451_v14  ;;  %1300 = vmatmul.msk.bf16.vlgmr.msra.gmra.mxu2 %vm497_vm2, %v451_v14 }
  0x60   : > { %561 = vmatpush.bf16.msrb.mxu3 %v549_v25 }
  0x62   : > { %596 = vperm.xlu0 %1440, %v588_v32   ;;  %v644_v32 = vadd.s32 128, %v643_v29 }
  0x64   : > { %562 = vmatpush.bf16.msrb.mxu3 %v547_v31 }
  0x68   : > { %1303 = vmatmul.msk.bf16.vlgmr.msrb.gmra.mxu1 %vm551_vm3, %v538_v35 }
  0x6f   : > { %1302 = vmatmul.msk.bf16.vlgmr.msrb.gmra.mxu3 %vm551_vm3, %v538_v35  ;;  %v649_v35 = vand.u32 15, %v643_v29  ;;  %vm828_vm3 = vcmask 908288  }
  0x71   : > { %vm2063_vm9 = vcmp.ge.s32.totalorder %v649_v35, 1  ;;  %vm671_vm14 = vcmp.le.s32.totalorder %v649_v35, 14 }
  0x72   : > { %vm2084_vm11 = vmpackc.low %vm2063_vm9, %vm2063_vm9 }
  0x73   : > { %vm2113_vm0 = vmpackc.low %vm671_vm14, %vm671_vm14 }
  0xcc   : > { %v592_v44 = vpop.permute.xlu0 %591 }
  0xd4   : > { %v597_v59 = vpop.permute.xlu0 %596 }
  0xd5   : > { %v492_v36 = vpop.f32.mrf.mxu1 }
  0xd8   : > { %v478_v41 = vpop.f32.mrf.mxu0 }
  0xdd   : > { %v494_v38 = vpop.f32.mrf.mxu1 }
  0xe0   : > { %v480_v50 = vpop.f32.mrf.mxu0 }
  0xe2   : > { %v531_v37 = vpop.f32.mrf.mxu3  ;;  %v517_v42 = vpop.f32.mrf.mxu2 }
  0xe3   : > { %v518_v43 = vadd.f32 %v517_v42, %v478_v41  ;;  %v532_v48 = vadd.f32 %v531_v37, %v492_v36  ;;  %v656_v36 = vand.u32 15, %v644_v32 }
  0xe5   : > { %v578_v45 = vpop.f32.mrf.mxu1  ;;  %vm2067_vm10 = vcmp.ge.s32.totalorder %v656_v36, 1  ;;  %vm2096_vm15 = vcmp.le.s32.totalorder %v656_v36, 14 }
  0xe6   : > { %v584_v52 = vadd.f32 %v578_v45, %v532_v48  ;;  %vm2092_vm13 = vmpackc.low %vm2067_vm10, %vm2067_vm10 }
  0xe7   : > { %vm2126_vm2 = vmpackc.low %vm2096_vm15, %vm2096_vm15 }
  0xe8   : > { %v600_v56 = vadd.f32 %v592_v44, %v584_v52 }
  0xea   : > { %v533_v39 = vpop.f32.mrf.mxu3  ;;  %v519_v51 = vpop.f32.mrf.mxu2  ;;  %v604_v62 = vmax.f32 %v600_v56, 0.0 }
  0xeb   : > { %v520_v54 = vadd.f32 %v519_v51, %v480_v50  ;;  %v534_v60 = vadd.f32 %v533_v39, %v494_v38 }
  0xed   : > { %v580_v58 = vpop.f32.mrf.mxu1 }
  0xee   : > { %v586_v63 = vadd.f32 %v580_v58, %v534_v60 }
  0xf0   : > { %v602_v1 = vadd.f32 %v597_v59, %v586_v63 }
  0xf2   : > { %v564_v46 = vpop.f32.mrf.mxu3  ;;  %v606_v2 = vmax.f32 %v602_v1, 0.0 }
  0xf3   : > { %v583_v47 = vadd.f32 %v564_v46, %v518_v43 }
  0xf5   : > { %v599_v49 = vadd.f32 %v592_v44, %v583_v47 }
  0xf7   : > { %v603_v53 = vmax.f32 %v599_v49, 0.0 }
  0xf9   : > { %618 = vrot.lane.b32.xlu1 %v603_v53, %s1770_s21 }
  0xfa   : > { %v566_v55 = vpop.f32.mrf.mxu3 }
  0xfb   : > { %v585_v57 = vadd.f32 %v566_v55, %v520_v54 }
  0xfd   : > { %v601_v61 = vadd.f32 %v597_v59, %v585_v57 }
  0xff   : > { %v605_v0 = vmax.f32 %v601_v61, 0.0 }
 0x101   : > { %622 = vrot.lane.b32.xlu2 %v605_v0, %s1770_s21  ;;  %620 = vrot.lane.b32.xlu1 %v604_v62, %s1770_s21 }
 0x109   : > { %624 = vrot.lane.b32.xlu2 %v606_v2, %s1770_s21  ;;  %s1149_s21 = sshll.u32 %s442_s22, 4  ;;  %s1150_s21 = int_to_ptr.vmem [resolvable:$true] %s1149_s21 }
 0x15b   : > { %v623_v3 = vpop.permute.xlu2 %622 }
 0x15c   : > { %639 = vst.msk [vmem:[#allocation2 + $0x18] sm:$0xff] %vm635_vm5, %v623_v3 }
 0x163   : > { %v625_v4 = vpop.permute.xlu2 %624  ;;  %v2033_v9 = vld [vmem:[#allocation2 + $0x18] sm:$0xff] }
 0x164   : > { %v2029_v5 = vsel %vm626_vm6, %v623_v3, %v625_v4  ;;  %641 = vst.msk [vmem:[#allocation2 + $0x28] sm:$0xff] %vm626_vm6, %v625_v4 }
 0x165   : > { %v1516_v17 = vpack.i.bf16 %v2029_v5, %v2033_v9 }
 0x16b   : > { %v619_v6 = vpop.permute.xlu1 %618  ;;  %v928_v15 = vld [vmem:[#allocation2 + $0x28] sm:$0xff] }
 0x16c   : > { %636 = vst.msk [vmem:[#allocation2] sm:$0xff] %vm635_vm5, %v619_v6  ;;  %vm746_vm5 = vcmask 1031168  }
 0x173   : > { %v621_v7 = vpop.permute.xlu1 %620  ;;  %v2031_v8 = vld [vmem:[#allocation2] sm:$0xff] }
 0x174   : > { %v2035_v10 = vsel %vm626_vm6, %v619_v6, %v621_v7  ;;  %638 = vst.msk [vmem:[#allocation2 + $0x10] sm:$0xff] %vm626_vm6, %v621_v7  ;;  %v1328_v11 = vpack.c.bf16 %v2033_v9, %v2031_v8  ;;  %vm709_vm6 = vcmask 1039360  }
 0x175   : > { %v1441_v12 = vpack.i.bf16 %v2035_v10, %v2031_v8  ;;  %v1346_v13 = vpack.c.bf16 %v2029_v5, %v2035_v10 }
 0x177   : > { %1442 = vrot.lane.b32.xlu0 %v1441_v12, %s1771_s26  ;;  %1447 = vrot.lane.b32.xlu2 %v1441_v12, %s1772_s15 }
 0x17b   : > { %v925_v14 = vld [vmem:[#allocation2 + $0x10] sm:$0xff] }
 0x17c   : > { %v1451_v16 = vpack.i.bf16 %v928_v15, %v925_v14 }
 0x17e   : > { %1452 = vrot.lane.b32.xlu1 %v1451_v16, %s1771_s26 }
 0x17f   : > { %1517 = vrot.lane.b32.xlu0 %v1516_v17, %s1772_s15  ;;  %1457 = vrot.lane.b32.xlu2 %v1441_v12, %s1773_s28 }
 0x186   : > { %1462 = vrot.lane.b32.xlu1 %v1451_v16, %s1772_s15  ;;  %s1696_s15 = sshra.s32 %s1152_s7, 4  ;;  %s1697_s15 = int_to_ptr.hbm [resolvable:$true] %s1696_s15 }
 0x187   : > { %1522 = vrot.lane.b32.xlu0 %v1516_v17, %s1773_s28  ;;  %1467 = vrot.lane.b32.xlu2 %v1441_v12, %s1774_s11  ;;  %p1703_p10 = scmp.lt.s32.totalorder %s1697_s15, %s2224_s9 }
 0x18e   : > { %1472 = vrot.lane.b32.xlu1 %v1451_v16, %s1773_s28  ;;  %s1698_s28 = scalar_lea.hbm %s1697_s15, 32 }
 0x18f   : > { %1527 = vrot.lane.b32.xlu0 %v1516_v17, %s1774_s11  ;;  %1477 = vrot.lane.b32.xlu2 %v1441_v12, %s1775_s18  ;;  %p1699_p1 = scmp.ne.s32.totalorder %s1697_s15, %s1698_s28 }
 0x191   : > { %p1700_p4 = pnand %p1699_p1, %p1903_p5 }
 0x193   : > { %p1701_p2 = pneg %p1700_p4 }
 0x196   : > { %1482 = vrot.lane.b32.xlu1 %v1516_v17, %s1771_s26 }
 0x197   : > { %1532 = vrot.lane.b32.xlu0 %v1516_v17, %s1775_s18  ;;  %1492 = vrot.lane.b32.xlu2 %v1441_v12, %s1776_s27 }
 0x19e   : > { %1487 = vrot.lane.b32.xlu1 %v1451_v16, %s1774_s11 }
 0x19f   : > { %1537 = vrot.lane.b32.xlu0 %v1516_v17, %s1776_s27  ;;  %1502 = vrot.lane.b32.xlu2 %v1441_v12, %s1777_s29 }
 0x1a6   : > { %1497 = vrot.lane.b32.xlu1 %v1451_v16, %s1775_s18 }
 0x1a7   : > { %1542 = vrot.lane.b32.xlu0 %v1516_v17, %s1777_s29  ;;  %1512 = vrot.lane.b32.xlu2 %v1451_v16, %s1777_s29 }
 0x1ae   : > { %1507 = vrot.lane.b32.xlu1 %v1451_v16, %s1776_s27  ;;  %s1702_s27 = scalar_lea.hbm %s2224_s9, 64 }
 0x1af   : > { %1547 = vrot.lane.b32.xlu0 %v1441_v12, %s1778_s14  ;;  %1557 = vrot.lane.b32.xlu2 %v1451_v16, %s1778_s14  ;;  %p1704_p11 = scmp.lt.s32.totalorder %s1702_s27, %s1698_s28 }
 0x1b1   : > { %p1705_p9 = por %p1704_p11, %p1703_p10 }
 0x1b3   : > { %p1706_p12 = pnand %p1705_p9, %p1701_p2 }
 0x1b6   : > { %1552 = vrot.lane.b32.xlu1 %v1516_v17, %s1778_s14 }
 0x1b7   : > { %1065 = vperm.xlu0 %1440, %v1061_v18  }
 0x1be   : > { %1070 = vperm.xlu1 %1561, %v1062_v27  }
 0x1d1   : > { %v1448_v19 = vpop.permute.xlu2 %1447 }
 0x1d2   : > { %v1450_v41 = vunpack.i.h.bf16 %v1448_v19  ;;  %v1449_v49 = vunpack.i.l.bf16 %v1448_v19 }
 0x1d4   : > { %v907_v2 = vsel %vm906_vm8, %v1449_v49, %v1450_v41 }
 0x1d9   : > { %v2048_v20 = vpop.permute.xlu2 %1457 }
 0x1da   : > { %v1460_v1 = vunpack.i.h.bf16 %v2048_v20  ;;  %v1459_v4 = vunpack.i.l.bf16 %v2048_v20 }
 0x1e1   : > { %v2050_v24 = vpop.permute.xlu2 %1467 }
 0x1e2   : > { %v1470_v29 = vunpack.i.h.bf16 %v2050_v24 }
 0x1e9   : > { %v1443_v21 = vpop.permute.xlu0 %1442  ;;  %v2054_v28 = vpop.permute.xlu2 %1477 }
 0x1ea   : > { %v1445_v33 = vunpack.i.h.bf16 %v1443_v21  ;;  %v1444_v34 = vunpack.i.l.bf16 %v1443_v21 }
 0x1ec   : > { %v948_v50 = vsel %vm947_vm7, %v1444_v34, %v1445_v33 }
 0x1f0   : > { %v1453_v22 = vpop.permute.xlu1 %1452 }
 0x1f1   : > { %v1518_v23 = vpop.permute.xlu0 %1517  ;;  %v1454_v37 = vunpack.i.l.bf16 %v1453_v22  ;;  %v2058_v40 = vpop.permute.xlu2 %1492  ;;  %v1455_v42 = vunpack.i.h.bf16 %v1453_v22 }
 0x1f2   : > { %v1520_v38 = vunpack.i.h.bf16 %v1518_v23  ;;  %v1519_v39 = vunpack.i.l.bf16 %v1518_v23  ;;  %v1495_v52 = vunpack.i.h.bf16 %v2058_v40 }
 0x1f3   : > { %v949_v54 = vsel %vm947_vm7, %v1445_v33, %v1454_v37 }
 0x1f4   : > { %v909_v56 = vsel %vm906_vm8, %v1519_v39, %v1520_v38  ;;  %v1480_v39 = vunpack.i.h.bf16 %v2054_v28 }
 0x1f5   : > { %v1316_v6 = vpack.c.bf16 %v909_v56, %v907_v2 }
 0x1f8   : > { %v1463_v25 = vpop.permute.xlu1 %1462 }
 0x1f9   : > { %v2052_v26 = vpop.permute.xlu0 %1522  ;;  %v1465_v44 = vunpack.i.h.bf16 %v1463_v25  ;;  %v1464_v45 = vunpack.i.l.bf16 %v1463_v25  ;;  %v2103_v19 = vpop.permute.xlu2 %1502 }
 0x1fa   : > { %v1525_v57 = vunpack.i.h.bf16 %v2052_v26  ;;  %v1524_v58 = vunpack.i.l.bf16 %v2052_v26 }
 0x1fb   : > { %v908_v63 = vsel %vm906_vm8, %v1450_v41, %v1464_v45  ;;  %v910_v0 = vsel %vm906_vm8, %v1520_v38, %v1465_v44  ;;  %v1479_v41 = vunpack.i.l.bf16 %v2054_v28 }
 0x1fc   : > { %v1334_v17 = vpack.c.bf16 %v910_v0, %v908_v63  ;;  %v868_v18 = vsel %vm865_vm12, %v1524_v58, %v1525_v57  ;;  %v1504_v63 = vunpack.i.l.bf16 %v2103_v19 }
 0x1fd   : > { %v788_v28 = vsel %vm787_vm4, %v1479_v41, %v1480_v39 }
 0x200   : > { %v1473_v30 = vpop.permute.xlu1 %1472 }
 0x201   : > { %v2056_v31 = vpop.permute.xlu0 %1527  ;;  %v1475_v61 = vunpack.i.h.bf16 %v1473_v30  ;;  %v1474_v62 = vunpack.i.l.bf16 %v1473_v30  ;;  %v1469_v30 = vunpack.i.l.bf16 %v2050_v24 }
 0x202   : > { %v1530_v14 = vunpack.i.h.bf16 %v2056_v31  ;;  %v1529_v15 = vunpack.i.l.bf16 %v2056_v31  ;;  %v866_v31 = vsel %vm865_vm12, %v1459_v4, %v1460_v1 }
 0x203   : > { %v867_v22 = vsel %vm865_vm12, %v1460_v1, %v1474_v62  ;;  %v869_v23 = vsel %vm865_vm12, %v1525_v57, %v1475_v61  ;;  %v1319_v35 = vpack.c.bf16 %v868_v18, %v866_v31  ;;  %v1505_v62 = vunpack.i.h.bf16 %v2103_v19 }
 0x204   : > { %v1337_v36 = vpack.c.bf16 %v869_v23, %v867_v22  ;;  %v831_v37 = vsel %vm828_vm3, %v1529_v15, %v1530_v14  ;;  %v1001_v23 = vld [vmem:[#allocation10] sm:$0xff] }
 0x205   : > { %v710_v12 = vsel %vm709_vm6, %v1504_v63, %v1505_v62 }
 0x208   : > { %v1483_v43 = vpop.permute.xlu1 %1482 }
 0x209   : > { %v1485_v46 = vunpack.i.h.bf16 %v1483_v43  ;;  %v1484_v47 = vunpack.i.l.bf16 %v1483_v43  ;;  %v2060_v48 = vpop.permute.xlu0 %1532 }
 0x20a   : > { %v1535_v33 = vunpack.i.h.bf16 %v2060_v48  ;;  %v1534_v34 = vunpack.i.l.bf16 %v2060_v48 }
 0x20b   : > { %v950_v53 = vsel %vm947_vm7, %v1484_v47, %v1485_v46  ;;  %v951_v55 = vsel %vm947_vm7, %v1485_v46, %v1455_v42  ;;  %v829_v42 = vsel %vm828_vm3, %v1469_v30, %v1470_v29  ;;  %vm984_vm7 = vcmask 769024  }
 0x20c   : > { %v1057_v59 = vpack.c.bf16 %v950_v53, %v948_v50  ;;  %v1058_v60 = vpack.c.bf16 %v951_v55, %v949_v54  ;;  %v1051_v44 = vpack.c.bf16 %v831_v37, %v829_v42  ;;  %v790_v46 = vsel %vm787_vm4, %v1534_v34, %v1535_v33  ;;  %v1513_v54 = vpop.permute.xlu2 %1512 }
 0x20d   : > { %v1494_v53 = vunpack.i.l.bf16 %v2058_v40  ;;  %v1322_v57 = vpack.c.bf16 %v790_v46, %v788_v28  ;;  %v1514_v15 = vunpack.i.l.bf16 %v1513_v54 }
 0x20e   : > { %1076 = vmatpush.bf16.msrb.mxu2 %v1057_v59  ;;  %1104 = vmatpush.bf16.msrb.mxu0 %v1058_v60 }
 0x20f   : > { %v747_v40 = vsel %vm746_vm5, %v1494_v53, %v1495_v52  ;;  %v711_v30 = vsel %vm709_vm6, %v1505_v62, %v1514_v15 }
 0x210   : > { %v1488_v16 = vpop.permute.xlu1 %1487 }
 0x211   : > { %v1490_v20 = vunpack.i.h.bf16 %v1488_v16  ;;  %v1489_v21 = vunpack.i.l.bf16 %v1488_v16  ;;  %v2107_v25 = vpop.permute.xlu0 %1537 }
 0x212   : > { %1317 = vmatpush.bf16.msk.msrb.mxu2 %vm2084_vm11, %v1316_v6  ;;  %1335 = vmatpush.bf16.msk.msrb.mxu0 %vm2092_vm13, %v1334_v17  ;;  %v1540_v49 = vunpack.i.h.bf16 %v2107_v25  ;;  %v1539_v50 = vunpack.i.l.bf16 %v2107_v25  ;;  %v1003_v25 = vld [vmem:[#allocation10 + $0x10] sm:$0xff] }
 0x213   : > { %v830_v38 = vsel %vm828_vm3, %v1470_v29, %v1489_v21  ;;  %v832_v24 = vsel %vm828_vm3, %v1530_v14, %v1490_v20  ;;  %v1515_v14 = vunpack.i.h.bf16 %v1513_v54 }
 0x214   : > { %v1052_v45 = vpack.c.bf16 %v832_v24, %v830_v38  ;;  %v749_v61 = vsel %vm746_vm5, %v1539_v50, %v1540_v49  ;;  %v1558_v21 = vpop.permute.xlu2 %1557  ;;  %v1005_v38 = vpack.c.bf16 %v1003_v25, %v1001_v23  ;;  %v1002_v24 = vld [vmem:[#allocation10 + $0x8] sm:$0xff] }
 0x215   : > { %v1325_v1 = vpack.c.bf16 %v749_v61, %v747_v40  ;;  %v1560_v31 = vunpack.i.h.bf16 %v1558_v21 }
 0x216   : > { %1320 = vmatpush.bf16.msk.msrb.mxu2 %vm2113_vm0, %v1319_v35  ;;  %1338 = vmatpush.bf16.msk.msrb.mxu0 %vm2126_vm2, %v1337_v36  ;;  %v1559_v35 = vunpack.i.l.bf16 %v1558_v21 }
 0x218   : > { %v1498_v43 = vpop.permute.xlu1 %1497 }
 0x219   : > { %v1500_v47 = vunpack.i.h.bf16 %v1498_v43  ;;  %v1499_v48 = vunpack.i.l.bf16 %v1498_v43  ;;  %v1543_v51 = vpop.permute.xlu0 %1542 }
 0x21a   : > { %1079 = vmatpush.bf16.msrb.mxu2 %v1051_v44  ;;  %1107 = vmatpush.bf16.msrb.mxu0 %v1052_v45  ;;  %v1545_v59 = vunpack.i.h.bf16 %v1543_v51  ;;  %v1544_v60 = vunpack.i.l.bf16 %v1543_v51 }
 0x21b   : > { %v789_v55 = vsel %vm787_vm4, %v1480_v39, %v1499_v48  ;;  %v791_v56 = vsel %vm787_vm4, %v1535_v33, %v1500_v47  ;;  %v1004_v39 = vld [vmem:[#allocation10 + $0x18] sm:$0xff] }
 0x21c   : > { %v1340_v58 = vpack.c.bf16 %v791_v56, %v789_v55  ;;  %v712_v6 = vsel %vm709_vm6, %v1544_v60, %v1545_v59  ;;  %v713_v22 = vsel %vm709_vm6, %v1545_v59, %v1515_v14  ;;  %v1006_v47 = vpack.c.bf16 %v1004_v39, %v1002_v24 }
 0x21d   : > { %v1045_v19 = vpack.c.bf16 %v712_v6, %v710_v12  ;;  %v1046_v34 = vpack.c.bf16 %v713_v22, %v711_v30 }
 0x21e   : > { %1323 = vmatpush.bf16.msk.msrb.mxu2 %vm2084_vm11, %v1322_v57  ;;  %1341 = vmatpush.bf16.msk.msrb.mxu0 %vm2092_vm13, %v1340_v58 }
 0x220   : > { %v1508_v0 = vpop.permute.xlu1 %1507 }
 0x221   : > { %v1510_v2 = vunpack.i.h.bf16 %v1508_v0  ;;  %v1509_v4 = vunpack.i.l.bf16 %v1508_v0  ;;  %v1548_v20 = vpop.permute.xlu0 %1547 }
 0x222   : > { %1326 = vmatpush.bf16.msk.msrb.mxu2 %vm2113_vm0, %v1325_v1  ;;  %v1550_v27 = vunpack.i.h.bf16 %v1548_v20  ;;  %v1549_v29 = vunpack.i.l.bf16 %v1548_v20 }
 0x223   : > { %v748_v16 = vsel %vm746_vm5, %v1495_v52, %v1509_v4  ;;  %v750_v17 = vsel %vm746_vm5, %v1540_v49, %v1510_v2 }
 0x224   : > { %v1343_v18 = vpack.c.bf16 %v750_v17, %v748_v16  ;;  %v985_v43 = vsel %vm984_vm7, %v1549_v29, %v1550_v27  ;;  %v986_v44 = vsel %vm984_vm7, %v1550_v27, %v1559_v35 }
 0x226   : > { %1344 = vmatpush.bf16.msk.msrb.mxu0 %vm2126_vm2, %v1343_v18  ;;  %1082 = vmatpush.bf16.msrb.mxu2 %v1045_v19 }
 0x228   : > { %v1553_v33 = vpop.permute.xlu1 %1552 }
 0x229   : > { %v1555_v36 = vunpack.i.h.bf16 %v1553_v33  ;;  %v1554_v37 = vunpack.i.l.bf16 %v1553_v33  ;;  %v1066_v8 = vpop.permute.xlu0 %1065 }
 0x22a   : > { %1110 = vmatpush.bf16.msrb.mxu0 %v1046_v34  ;;  %1329 = vmatpush.bf16.msk.msrb.mxu2 %vm2084_vm11, %v1328_v11 }
 0x22b   : > { %v987_v41 = vsel %vm984_vm7, %v1554_v37, %v1555_v36  ;;  %v988_v42 = vsel %vm984_vm7, %v1555_v36, %v1560_v31 }
 0x22c   : > { %v1331_v45 = vpack.c.bf16 %v987_v41, %v985_v43  ;;  %v1349_v46 = vpack.c.bf16 %v988_v42, %v986_v44 }
 0x22d   : > { %1084 = vmatmul.bf16.vlgmr.msrb.gmra.mxu2 %v1005_v38 }
 0x22e   : > { %1347 = vmatpush.bf16.msk.msrb.mxu0 %vm2092_vm13, %v1346_v13  ;;  %1332 = vmatpush.bf16.msk.msra.mxu3 %vm2113_vm0, %v1331_v45 }
 0x22f   : > { %1350 = vmatpush.bf16.msk.msra.mxu1 %vm2126_vm2, %v1349_v46 }
 0x230   : > { %v1071_v26 = vpop.permute.xlu1 %1070 }
 0x231   : > { %1112 = vmatmul.bf16.vlgmr.msrb.gmra.mxu0 %v1005_v38  ;;  %1304 = vmatmul.msk.bf16.vlgmr.msra.gmra.mxu3 %vm465_vm1, %v1006_v47 }
 0x232   : > { %1305 = vmatmul.msk.bf16.vlgmr.msra.gmra.mxu1 %vm465_vm1, %v1006_v47 }
 0x2ae   : > { %v1113_v9 = vpop.f32.mrf.mxu0 }
 0x2af   : > { %v1114_v11 = vadd.f32 %v1113_v9, %v1066_v8  ;;  %v1127_v3 = vpop.f32.mrf.mxu1 }
 0x2b0   : > { %v1085_v5 = vpop.f32.mrf.mxu2 }
 0x2b1   : > { %v1128_v10 = vadd.f32 %v1127_v3, %v1114_v11  ;;  %v1086_v13 = vadd.f32 %v1085_v5, %v1066_v8 }
 0x2b3   : > { %1133 = vst [vmem:[%s442_s22 + $0x8] sm:$0xff] %v1128_v10 }
 0x2b4   : > { %v1099_v7 = vpop.f32.mrf.mxu3 }
 0x2b5   : > { %v1100_v32 = vadd.f32 %v1099_v7, %v1086_v13 }
 0x2b6   : > { %v1115_v48 = vpop.f32.mrf.mxu0 }
 0x2b7   : > { %1132 = vst [vmem:[%s442_s22] sm:$0xff] %v1100_v32  ;;  %v1116_v49 = vadd.f32 %v1115_v48, %v1071_v26  ;;  %v1129_v28 = vpop.f32.mrf.mxu1 }
 0x2b8   : > { %v1087_v50 = vpop.f32.mrf.mxu2 }
 0x2b9   : > { %v1130_v51 = vadd.f32 %v1129_v28, %v1116_v49  ;;  %v1088_v52 = vadd.f32 %v1087_v50, %v1071_v26 }
 0x2bb   : > { %1135 = vst [vmem:[%s442_s22 + $0x18] sm:$0xff] %v1130_v51 }
 0x2bc   : > { %v1101_v53 = vpop.f32.mrf.mxu3 }
 0x2bd   : > { %v1102_v54 = vadd.f32 %v1101_v53, %v1088_v52 }
 0x2bf   : > { %1134 = vst [vmem:[%s442_s22 + $0x10] sm:$0xff] %v1102_v54 }
 0x2c0   : > { %1709 = shalt.err (!%p1706_p12)
}
 0x2c1   : > { %s1779_s5 = smov 256   ;;  %s1780_s19 = smov 16  }
 0x2c2   : > { %1363 = dma.vmem_to_hbm [thread:$0]  (%p1903_p5), %s1150_s21, 512, %s1152_s7, %s1137_s13, %s1779_s5, %s1779_s5, %s1780_s19  }
 0x2c3 PF: > { %s2268_s23 = sld [smem:[#allocation18_spill]]  ;;  %p2270_p13 = scmp.ge.s32.totalorder %s1760_s12, 2 }
 0x2c5   : > { %p1380_p0 = pnand %p2270_p13, %p1866_p6 }
 0x2c7   : > { %p1381_p3 = pneg %p1380_p0 }
 0x2c9   : > { %s1166_s16 = sand.u32 1, %s2268_s23  }
 0x2ca   : > { %s1167_s22 = scalar_lea.sflag [#allocation6], %s1166_s16 }
 0x2cb   : > { %1743 = dma.done.wait (%p1381_p3), %s1167_s22, 512  }
 0x2cc   : > { %1745 = vsyncadd (%p1381_p3), %s1167_s22, 4294966784  ;;  %s2271_s12 = sld [smem:[#allocation21_spill]]  ;;  %s2274_s30 = smov %s1752_s10 }
 0x2cd   : > { %s2272_s20 = sld [smem:[#allocation19_spill]] }
 0x2ce   : > { %s2273_s11 = sld [smem:[#allocation22_spill]] }
 0x2d2   : > { %p26_p7 = scmp.ge.s32.totalorder %s2271_s12, 4  }
 0x2d3   : > { %s2275_s10 = smov %s2272_s20 }
 0x2d4   :  { %28 = sbr.rel (!%p26_p7) target bundleno = 11 (0xb), region = 125 }
 0x2d9   :  { %1173 = vsyncpa [#allocation5], 1 }
 0x2da   :  { %1175 = vsyncpa [#allocation5 + $0x1], 1 }
 0x2db   :  { %1176 = vsyncpa [#allocation8], 1 }
 0x2dc   :  { %1178 = vsyncpa [#allocation8 + $0x1], 1 }
 0x2dd   :  { %1179 = vsyncpa [#allocation11], 1 }
 0x2de   :  { %1180 = vsyncpa [#allocation6], 1 }
 0x2df   :  { %1182 = vsyncpa [#allocation6 + $0x1], 1 }

</bundles_post_ra>
